<compile_context>
chip_gen: v7x
topology: tpu7x:2x2x1
jax: 0.10.0
libtpu: 0.0.40
codegen_flags: <defaults>
</compile_context>

<pallas_src>
import jax
import jax.numpy as jnp
from jax import lax
from jax.experimental import pallas as pl
from jax.experimental.pallas import tpu as pltpu


def _round_up(x, m):
    return (x + m - 1) // m * m


def _init_linear(key, fan_in, fan_out):
    """PyTorch-style nn.Linear init: U(-1/sqrt(fan_in), +1/sqrt(fan_in))."""
    kw, kb = jax.random.split(key)
    bound = 1.0 / jnp.sqrt(jnp.float32(fan_in))
    w = jax.random.uniform(kw, (fan_in, fan_out), jnp.float32, -bound, bound)
    b = jax.random.uniform(kb, (1, fan_out), jnp.float32, -bound, bound)
    return w, b


def build_critic_params(key, dims, state_dim, action_dim):
    """Mirrors build_mlp(dims=[state_dim + action_dim, *dims, 1])."""
    layer_dims = [state_dim + action_dim, *dims, 1]
    params = []
    for i in range(len(layer_dims) - 1):
        key, sub = jax.random.split(key)
        params.append(_init_linear(sub, layer_dims[i], layer_dims[i + 1]))
    return params


# contract the LAST dims of both operands: (1, h) x (tile, h) -> (1, tile)
_TRANS_B_DIMS = (((1,), (1,)), ((), ()))


def make_critic_kernel(n_layers):
    def kernel(*refs):
        # refs = (state, action, <flat params...>, out)
        s_ref, a_ref = refs[0], refs[1]
        o_ref = refs[-1]
        p = refs[2:-1]

        if n_layers == 1:
            # Single linear layer: the weight slices are passed transposed so
            # the result comes out directly as a lane-dense (1, tile) row.
            w_s_t, w_a_t, b = p
            row = lax.dot_general(w_s_t[...], s_ref[...], _TRANS_B_DIMS,
                                  preferred_element_type=jnp.float32)
            row = row + lax.dot_general(w_a_t[...], a_ref[...], _TRANS_B_DIMS,
                                        preferred_element_type=jnp.float32)
            o_ref[...] = (row + b[...]).astype(o_ref.dtype)
            return

        # --- first layer: split weight avoids the lane-axis concat ---
        w0_s, w0_a, b0 = p[0], p[1], p[2]
        x = (jnp.dot(s_ref[...], w0_s[...], preferred_element_type=jnp.float32)
             + jnp.dot(a_ref[...], w0_a[...], preferred_element_type=jnp.float32)
             + b0[...])
        x = jnp.maximum(x, 0.0)

        # --- middle layers ---
        idx = 3
        for _ in range(n_layers - 2):
            w = p[idx][...]
            b = p[idx + 1][...]
            idx += 2
            x = jnp.dot(x, w, preferred_element_type=jnp.float32) + b
            x = jnp.maximum(x, 0.0)

        # --- last layer: weight passed transposed as (1, h_last) so the
        #     output is a lane-dense (1, batch_tile) row ---
        w_last_t = p[idx][...]
        b_last = p[idx + 1][...]
        row = lax.dot_general(w_last_t, x, _TRANS_B_DIMS,
                              preferred_element_type=jnp.float32)
        o_ref[...] = (row + b_last).astype(o_ref.dtype)

    return kernel


def critic_forward(state, action, params, *, batch_tile=512):
    B, state_dim = state.shape
    _, action_dim = action.shape
    n_layers = len(params)

    # --- re-layout the parameters for the kernel ---
    if n_layers == 1:
        w0, b0 = params[0]
        flat_params = [w0[:state_dim].T, w0[state_dim:].T, b0.reshape(1, 1)]
    else:
        w0, b0 = params[0]
        flat_params = [w0[:state_dim], w0[state_dim:], b0]
        for w, b in params[1:-1]:
            flat_params.extend([w, b])
        w_last, b_last = params[-1]
        flat_params.extend([w_last.T, b_last.reshape(1, 1)])

    # --- choose the batch tile: big enough to feed the MXU and keep stores
    #     lane-dense, but aim for >=2 grid steps when the batch allows it
    #     (megacore sharding on v7x) ---
    target_steps = 2 if B >= 256 else 1
    tile = min(batch_tile,
               max(128, _round_up((B + target_steps - 1) // target_steps, 128)))
    padded_B = _round_up(B, tile)
    num_tiles = padded_B // tile

    if padded_B != B:
        pad = padded_B - B
        state = jnp.pad(state, ((0, pad), (0, 0)))
        action = jnp.pad(action, ((0, pad), (0, 0)))

    in_specs = [
        pl.BlockSpec((tile, state_dim), lambda i: (i, 0)),
        pl.BlockSpec((tile, action_dim), lambda i: (i, 0)),
    ]
    for arr in flat_params:
        in_specs.append(pl.BlockSpec(arr.shape, lambda i: (0, 0)))

    # Output is one lane-dense row of length padded_B; each grid step writes
    # its batch tile along the lane axis.
    out = pl.pallas_call(
        make_critic_kernel(n_layers),
        out_shape=jax.ShapeDtypeStruct((1, padded_B), jnp.float32),
        grid=(num_tiles,),
        in_specs=in_specs,
        out_specs=pl.BlockSpec((1, tile), lambda i: (0, i)),
        compiler_params=pltpu.CompilerParams(
            dimension_semantics=("parallel",)
        ),
    )(state, action, *flat_params)

    # (1, padded_B) is already in batch order -> (B, 1)
    return out.reshape(-1)[:B].reshape(B, 1)


def critic_reference(state, action, params):
    x = jnp.concatenate([state, action], axis=1)
    n = len(params)
    for i, (w, b) in enumerate(params):
        x = x @ w + b
        if i < n - 1:
            x = jnp.maximum(x, 0.0)
    return x


if __name__ == "__main__":
    key = jax.random.PRNGKey(0)
    k_params, k_state, k_action = jax.random.split(key, 3)

    # Small shapes consistent with Critic(dims=[64, 32], state_dim=12, action_dim=20)
    state_dim = 12
    action_dim = 20
    dims = [64, 32]
    params = build_critic_params(k_params, dims, state_dim, action_dim)

    # 1) tiny batch (single grid step, padded to one 128-row tile)
    batch = 8
    state = jax.random.normal(k_state, (batch, state_dim), jnp.float32)
    action = jax.random.normal(k_action, (batch, action_dim), jnp.float32)
    out = jax.block_until_ready(critic_forward(state, action, params))
    ref = critic_reference(state, action, params)
    assert out.shape == (batch, 1)
    assert jnp.allclose(out, ref, atol=1e-4, rtol=1e-4)

    # 2) non-divisible batch (exercises padding + a 2-step parallel grid)
    batch2 = 300
    k_s2, k_a2 = jax.random.split(jax.random.PRNGKey(1))
    state2 = jax.random.normal(k_s2, (batch2, state_dim), jnp.float32)
    action2 = jax.random.normal(k_a2, (batch2, action_dim), jnp.float32)
    out2 = jax.block_until_ready(critic_forward(state2, action2, params))
    ref2 = critic_reference(state2, action2, params)
    assert out2.shape == (batch2, 1)
    assert jnp.allclose(out2, ref2, atol=1e-4, rtol=1e-4)

    print("KERNEL_OK")
</pallas_src>

<mosaic_0001>
module attributes {stable_mosaic.version = 11 : i64} {
  func.func @kernel(%arg0: i32, %arg1: memref<128x12xf32, #tpu.memory_space<vmem>>, %arg2: memref<128x20xf32, #tpu.memory_space<vmem>>, %arg3: memref<12x64xf32, #tpu.memory_space<vmem>>, %arg4: memref<20x64xf32, #tpu.memory_space<vmem>>, %arg5: memref<1x64xf32, #tpu.memory_space<vmem>>, %arg6: memref<64x32xf32, #tpu.memory_space<vmem>>, %arg7: memref<1x32xf32, #tpu.memory_space<vmem>>, %arg8: memref<1x32xf32, #tpu.memory_space<vmem>>, %arg9: memref<1x1xf32, #tpu.memory_space<vmem>>, %arg10: memref<1x128xf32, #tpu.memory_space<vmem>>) attributes {dimension_semantics = [#tpu.dimension_semantics<parallel>], iteration_bounds = array<i64: 1>, scalar_prefetch = 0 : i64, scratch_operands = 0 : i64, tpu.core_type = #tpu.core_type<tc>, window_params = [{transform_indices = @transform_0, window_bounds = array<i64: 128, 12>}, {transform_indices = @transform_1, window_bounds = array<i64: 128, 20>}, {pipeline_mode = #tpu.pipeline_mode<synchronous>, transform_indices = @transform_2, window_bounds = array<i64: 12, 64>}, {pipeline_mode = #tpu.pipeline_mode<synchronous>, transform_indices = @transform_3, window_bounds = array<i64: 20, 64>}, {pipeline_mode = #tpu.pipeline_mode<synchronous>, transform_indices = @transform_4, window_bounds = array<i64: 1, 64>}, {pipeline_mode = #tpu.pipeline_mode<synchronous>, transform_indices = @transform_5, window_bounds = array<i64: 64, 32>}, {pipeline_mode = #tpu.pipeline_mode<synchronous>, transform_indices = @transform_6, window_bounds = array<i64: 1, 32>}, {pipeline_mode = #tpu.pipeline_mode<synchronous>, transform_indices = @transform_7, window_bounds = array<i64: 1, 32>}, {pipeline_mode = #tpu.pipeline_mode<synchronous>, transform_indices = @transform_8, window_bounds = array<i64: 1, 1>}, {transform_indices = @transform_9, window_bounds = array<i64: 1, 128>}]} {
    %c0 = arith.constant 0 : index
    %c0_0 = arith.constant 0 : index
    %0 = vector.load %arg1[%c0, %c0_0] : memref<128x12xf32, #tpu.memory_space<vmem>>, vector<128x12xf32>
    %c0_1 = arith.constant 0 : index
    %c0_2 = arith.constant 0 : index
    %1 = vector.load %arg3[%c0_1, %c0_2] : memref<12x64xf32, #tpu.memory_space<vmem>>, vector<12x64xf32>
    %cst = arith.constant dense<0.000000e+00> : vector<128x64xf32>
    %2 = tpu.matmul %0, %1, %cst {dimension_numbers = #tpu.dot_dimension_numbers<[1], [0], [0], [1], [0, 0, 1, 1], [], []>} : vector<128x12xf32>, vector<12x64xf32>, vector<128x64xf32> -> vector<128x64xf32>
    %c0_3 = arith.constant 0 : index
    %c0_4 = arith.constant 0 : index
    %3 = vector.load %arg2[%c0_3, %c0_4] : memref<128x20xf32, #tpu.memory_space<vmem>>, vector<128x20xf32>
    %c0_5 = arith.constant 0 : index
    %c0_6 = arith.constant 0 : index
    %4 = vector.load %arg4[%c0_5, %c0_6] : memref<20x64xf32, #tpu.memory_space<vmem>>, vector<20x64xf32>
    %cst_7 = arith.constant dense<0.000000e+00> : vector<128x64xf32>
    %5 = tpu.matmul %3, %4, %cst_7 {dimension_numbers = #tpu.dot_dimension_numbers<[1], [0], [0], [1], [0, 0, 1, 1], [], []>} : vector<128x20xf32>, vector<20x64xf32>, vector<128x64xf32> -> vector<128x64xf32>
    %6 = arith.addf %2, %5 : vector<128x64xf32>
    %c0_8 = arith.constant 0 : index
    %c0_9 = arith.constant 0 : index
    %7 = vector.load %arg5[%c0_8, %c0_9] : memref<1x64xf32, #tpu.memory_space<vmem>>, vector<1x64xf32>
    %8 = vector.broadcast %7 : vector<1x64xf32> to vector<128x64xf32>
    %9 = arith.addf %6, %8 : vector<128x64xf32>
    %cst_10 = arith.constant 0.000000e+00 : f32
    %10 = vector.broadcast %cst_10 : f32 to vector<128x64xf32>
    %11 = arith.maximumf %9, %10 : vector<128x64xf32>
    %c0_11 = arith.constant 0 : index
    %c0_12 = arith.constant 0 : index
    %12 = vector.load %arg6[%c0_11, %c0_12] : memref<64x32xf32, #tpu.memory_space<vmem>>, vector<64x32xf32>
    %c0_13 = arith.constant 0 : index
    %c0_14 = arith.constant 0 : index
    %13 = vector.load %arg7[%c0_13, %c0_14] : memref<1x32xf32, #tpu.memory_space<vmem>>, vector<1x32xf32>
    %cst_15 = arith.constant dense<0.000000e+00> : vector<128x32xf32>
    %14 = tpu.matmul %11, %12, %cst_15 {dimension_numbers = #tpu.dot_dimension_numbers<[1], [0], [0], [1], [0, 0, 1, 1], [], []>} : vector<128x64xf32>, vector<64x32xf32>, vector<128x32xf32> -> vector<128x32xf32>
    %15 = vector.broadcast %13 : vector<1x32xf32> to vector<128x32xf32>
    %16 = arith.addf %14, %15 : vector<128x32xf32>
    %cst_16 = arith.constant 0.000000e+00 : f32
    %17 = vector.broadcast %cst_16 : f32 to vector<128x32xf32>
    %18 = arith.maximumf %16, %17 : vector<128x32xf32>
    %c0_17 = arith.constant 0 : index
    %c0_18 = arith.constant 0 : index
    %19 = vector.load %arg8[%c0_17, %c0_18] : memref<1x32xf32, #tpu.memory_space<vmem>>, vector<1x32xf32>
    %c0_19 = arith.constant 0 : index
    %c0_20 = arith.constant 0 : index
    %20 = vector.load %arg9[%c0_19, %c0_20] : memref<1x1xf32, #tpu.memory_space<vmem>>, vector<1x1xf32>
    %cst_21 = arith.constant dense<0.000000e+00> : vector<1x128xf32>
    %21 = tpu.matmul %19, %18, %cst_21 {dimension_numbers = #tpu.dot_dimension_numbers<[1], [1], [0], [0], [0, 0, 1, 0], [], []>} : vector<1x32xf32>, vector<128x32xf32>, vector<1x128xf32> -> vector<1x128xf32>
    %22 = vector.broadcast %20 : vector<1x1xf32> to vector<1x128xf32>
    %23 = arith.addf %21, %22 : vector<1x128xf32>
    %c0_22 = arith.constant 0 : index
    %c0_23 = arith.constant 0 : index
    %24 = vector.load %arg10[%c0_22, %c0_23] : memref<1x128xf32, #tpu.memory_space<vmem>>, vector<1x128xf32>
    tpu.vector_store %arg10[%c0_22, %c0_23], %23 {strides = array<i32>} : memref<1x128xf32, #tpu.memory_space<vmem>>, vector<1x128xf32>,
    return
  }
  func.func @transform_0(%arg0: i32) -> (i32, i32) {
    %c0_i32 = arith.constant 0 : i32
    %c0_i32_0 = arith.constant 0 : i32
    return %arg0, %c0_i32 : i32, i32
  }
  func.func @transform_1(%arg0: i32) -> (i32, i32) {
    %c0_i32 = arith.constant 0 : i32
    %c0_i32_0 = arith.constant 0 : i32
    return %arg0, %c0_i32 : i32, i32
  }
  func.func @transform_2(%arg0: i32) -> (i32, i32) {
    %c0_i32 = arith.constant 0 : i32
    %c0_i32_0 = arith.constant 0 : i32
    %c0_i32_1 = arith.constant 0 : i32
    return %c0_i32, %c0_i32_0 : i32, i32
  }
  func.func @transform_3(%arg0: i32) -> (i32, i32) {
    %c0_i32 = arith.constant 0 : i32
    %c0_i32_0 = arith.constant 0 : i32
    %c0_i32_1 = arith.constant 0 : i32
    return %c0_i32, %c0_i32_0 : i32, i32
  }
  func.func @transform_4(%arg0: i32) -> (i32, i32) {
    %c0_i32 = arith.constant 0 : i32
    %c0_i32_0 = arith.constant 0 : i32
    %c0_i32_1 = arith.constant 0 : i32
    return %c0_i32, %c0_i32_0 : i32, i32
  }
  func.func @transform_5(%arg0: i32) -> (i32, i32) {
    %c0_i32 = arith.constant 0 : i32
    %c0_i32_0 = arith.constant 0 : i32
    %c0_i32_1 = arith.constant 0 : i32
    return %c0_i32, %c0_i32_0 : i32, i32
  }
  func.func @transform_6(%arg0: i32) -> (i32, i32) {
    %c0_i32 = arith.constant 0 : i32
    %c0_i32_0 = arith.constant 0 : i32
    %c0_i32_1 = arith.constant 0 : i32
    return %c0_i32, %c0_i32_0 : i32, i32
  }
  func.func @transform_7(%arg0: i32) -> (i32, i32) {
    %c0_i32 = arith.constant 0 : i32
    %c0_i32_0 = arith.constant 0 : i32
    %c0_i32_1 = arith.constant 0 : i32
    return %c0_i32, %c0_i32_0 : i32, i32
  }
  func.func @transform_8(%arg0: i32) -> (i32, i32) {
    %c0_i32 = arith.constant 0 : i32
    %c0_i32_0 = arith.constant 0 : i32
    %c0_i32_1 = arith.constant 0 : i32
    return %c0_i32, %c0_i32_0 : i32, i32
  }
  func.func @transform_9(%arg0: i32) -> (i32, i32) {
    %c0_i32 = arith.constant 0 : i32
    %c0_i32_0 = arith.constant 0 : i32
    return %c0_i32, %arg0 : i32, i32
  }
}

</mosaic_0001>

<bundles_post_ra>
// kernel: tpu_custom_call.1
= control target key start
LH: loop header
LB: loop body
LE: loop exit
PB: predicated region body
PF: predicated region fallthrough
CT: control target
= control target key end

     0   :  { %s1558_s0 = inlined_call_operand.vmem [shape: f32[128,12], index: 0, kind: input, shape index: {}]   ;;  %s1559_s1 = inlined_call_operand.vmem [shape: f32[128,20], index: 1, kind: input, shape index: {}]   ;;  %s1560_s2 = inlined_call_operand.vmem [shape: f32[12,64], index: 2, kind: input, shape index: {}]   ;;  %s1561_s3 = inlined_call_operand.vmem [shape: f32[20,64], index: 3, kind: input, shape index: {}]   ;;  %s1562_s4 = inlined_call_operand.vmem [shape: f32[1,64], index: 4, kind: input, shape index: {}]   ;;  %s1563_s5 = inlined_call_operand.vmem [shape: f32[64,32], index: 5, kind: input, shape index: {}]   ;;  %s1564_s6 = inlined_call_operand.vmem [shape: f32[1,32], index: 6, kind: input, shape index: {}]   ;;  %s1565_s7 = inlined_call_operand.vmem [shape: f32[1,32], index: 7, kind: input, shape index: {}]   ;;  %s1566_s8 = inlined_call_operand.<no memory space> [shape: f32[1,1], index: 8, kind: input, shape index: {}]   ;;  %s1567_s9 = inlined_call_operand.hbm [shape: f32[1,128], index: 9, kind: output, shape index: {}]  }
   0x1   :  { %v14_v0 = vstv %s1566_s8 }
   0x2   :  { %15 = vst [vmem:[#allocation2] sm:$0x1] %v14_v0 }
   0x3   :  { %v69_v1 = vld [vmem:[%s1561_s3] sm:$0xff]  ;;  %v70_v2 = vld [vmem:[%s1561_s3 + $0x8] sm:$0xff]  ;;  %vm72_vm0 = vcmask 162816   ;;  %v71_v5 = vld [vmem:[%s1561_s3 + $0x10] sm:$0xf]  ;;  %vm121_vm1 = vcmask 1043456  }
   0x4   :  { %v1159_v3 = vpack.c.bf16 %v70_v2, %v69_v1  ;;  %v53_v4 = vld [vmem:[%s1559_s1] sm:$0xff]  ;;  %v52_v7 = vld [vmem:[%s1560_s2 + $0x8] sm:$0xf]  ;;  %vm1264_vm2 = vmmov 1   ;;  %v55_v10 = vld [vmem:[%s1559_s1 + $0x10] sm:$0xff] }
   0x5   :  { %1032 = vmatprep.mubr.msk.f32.mxu0 %vm72_vm0, %v53_v4  ;;  %v51_v6 = vld [vmem:[%s1560_s2] sm:$0xff]  ;;  %v54_v9 = vld [vmem:[%s1559_s1 + $0x8] sm:$0xff]  ;;  %vm1164_vm3 = vmpackc.low %vm121_vm1, %vm1264_vm2 }
   0x6   :  { %1160 = vmatprep.subr.bf16.mxu0 %v1159_v3  ;;  %v1163_v8 = vpack.c.bf16 %v52_v7, %v51_v6  ;;  %v56_v11 = vld [vmem:[%s1559_s1 + $0x18] sm:$0xff]  ;;  %v57_v12 = vld [vmem:[%s1559_s1 + $0x20] sm:$0xff]  ;;  %v507_v14 = vld [vmem:[%s1563_s5 + $0x8] sm:$0xff] }
   0x7   :  { %1162 = vmatpush3.bf16.msra.mxu0 %v1159_v3  ;;  %v506_v13 = vld [vmem:[%s1563_s5] sm:$0xff]  ;;  %v508_v15 = vld [vmem:[%s1563_s5 + $0x10] sm:$0xff]  ;;  %v509_v16 = vld [vmem:[%s1563_s5 + $0x18] sm:$0xff] }
   0x8   :  { %1030 = vmatprep.subr.msk.mxu0 %vm121_vm1, %v71_v5  ;;  %v58_v17 = vld [vmem:[%s1559_s1 + $0x28] sm:$0xff]  ;;  %v1169_v18 = vpack.c.bf16 %v507_v14, %v506_v13  ;;  %v1173_v19 = vpack.c.bf16 %v509_v16, %v508_v15 }
   0xb   :  { %1031 = vmatpush3.msk.msra.mxu0 %vm121_vm1, %v71_v5 }
   0xc   :  { %1033 = vmatmul.mubr.msk.f32.vlgmr.msra.gmra.mrb[0].mxu0 %vm72_vm0, %v54_v9  ;;  %1165 = vmatprep.subr.msk.bf16.mxu0 %vm1164_vm3, %v1163_v8 }
   0xd   :  { %1168 = vmatpush3.bf16.msk.msra.mxu0 %vm1164_vm3, %v1163_v8  ;;  %1035 = vmatprep.mubr.msk.f32.mxu0 %vm72_vm0, %v55_v10 }
  0x10   :  { %1036 = vmatmul.mubr.msk.f32.gmra.mrb[2].mxu0 %vm72_vm0, %v56_v11 }
  0x11   :  { %1038 = vmatprep.mubr.msk.f32.mxu0 %vm72_vm0, %v57_v12 }
  0x12   :  { %16 = vsyncpa [#allocation4], 0  ;;  %v59_v20 = vld [vmem:[%s1559_s1 + $0x30] sm:$0xff]  ;;  %v510_v21 = vld [vmem:[%s1563_s5 + $0x20] sm:$0xff]  ;;  %1170 = vmatprep.subr.bf16.mxu1 %v1169_v18  ;;  %vm270_vm4 = vcmask 97280   ;;  %vm521_vm5 = vcmask 523264  }
  0x13   :  { %v511_v22 = vld [vmem:[%s1563_s5 + $0x28] sm:$0xff]  ;;  %1172 = vmatpush3.bf16.msra.mxu1 %v1169_v18  ;;  %v60_v23 = vld [vmem:[%s1559_s1 + $0x38] sm:$0xff]  ;;  %v61_v25 = vld [vmem:[%s1559_s1 + $0x40] sm:$0xff]  ;;  %vm1266_vm6 = vmmov 0   ;;  %vm742_vm7 = vcmask 261120   ;;  %s1269_s26 = smov [#allocation3]  }
  0x14   :  { %1039 = vmatmul.mubr.msk.f32.gmra.mrb[4].mxu0 %vm72_vm0, %v58_v17  ;;  %1174 = vmatprep.subr.bf16.mxu1 %v1173_v19  ;;  %v1177_v24 = vpack.c.bf16 %v511_v22, %v510_v21  ;;  %v62_v26 = vld [vmem:[%s1559_s1 + $0x48] sm:$0xff]  ;;  %v63_v27 = vld [vmem:[%s1559_s1 + $0x50] sm:$0xff]  ;;  %v64_v28 = vld [vmem:[%s1559_s1 + $0x58] sm:$0xff]  ;;  %s871_s27 = sshll.u32 %s1269_s26, 4  ;;  %s872_s27 = int_to_ptr.vmem [resolvable:$true] %s871_s27 }
  0x15   :  { %1041 = vmatprep.mubr.msk.f32.mxu0 %vm72_vm0, %v59_v20  ;;  %v65_v29 = vld [vmem:[%s1559_s1 + $0x60] sm:$0xff]  ;;  %v66_v30 = vld [vmem:[%s1559_s1 + $0x68] sm:$0xff]  ;;  %v67_v31 = vld [vmem:[%s1559_s1 + $0x70] sm:$0xff]  ;;  %s1240_s28 = scalar_lea.vmem %s872_s27, 16  ;;  %s1244_s29 = scalar_lea.vmem %s872_s27, 32 }
  0x16   :  { %v68_v32 = vld [vmem:[%s1559_s1 + $0x78] sm:$0xff]  ;;  %v35_v33 = vld [vmem:[%s1558_s0] sm:$0xff]  ;;  %v36_v34 = vld [vmem:[%s1558_s0 + $0x8] sm:$0xff]  ;;  %p1241_p0 = scmp.ne.s32.totalorder %s872_s27, %s1240_s28  ;;  %p1245_p1 = scmp.lt.s32.totalorder %s872_s27, %s872_s27 }
  0x17   :  { %1176 = vmatpush3.bf16.msra.mxu1 %v1173_v19  ;;  %v37_v35 = vld [vmem:[%s1558_s0 + $0x10] sm:$0xff]  ;;  %v38_v36 = vld [vmem:[%s1558_s0 + $0x18] sm:$0xff]  ;;  %v39_v37 = vld [vmem:[%s1558_s0 + $0x20] sm:$0xff]  ;;  %p1246_p2 = scmp.lt.s32.totalorder %s1244_s29, %s1240_s28 }
  0x18   :  { %1042 = vmatmul.mubr.msk.f32.gmra.mrb[6].mxu0 %vm72_vm0, %v60_v23  ;;  %1178 = vmatprep.subr.bf16.mxu1 %v1177_v24  ;;  %v40_v38 = vld [vmem:[%s1558_s0 + $0x28] sm:$0xff]  ;;  %v41_v39 = vld [vmem:[%s1558_s0 + $0x30] sm:$0xff]  ;;  %v42_v40 = vld [vmem:[%s1558_s0 + $0x38] sm:$0xff] }
  0x19   :  { %1044 = vmatprep.mubr.msk.f32.mxu0 %vm72_vm0, %v61_v25  ;;  %v43_v41 = vld [vmem:[%s1558_s0 + $0x40] sm:$0xff]  ;;  %v44_v42 = vld [vmem:[%s1558_s0 + $0x48] sm:$0xff]  ;;  %v45_v43 = vld [vmem:[%s1558_s0 + $0x50] sm:$0xff]  ;;  %p1247_p3 = por %p1246_p2, %p1245_p1 }
  0x1a   :  { %v46_v44 = vld [vmem:[%s1558_s0 + $0x58] sm:$0xff]  ;;  %v47_v45 = vld [vmem:[%s1558_s0 + $0x60] sm:$0xff]  ;;  %v48_v46 = vld [vmem:[%s1558_s0 + $0x68] sm:$0xff] }
  0x1b   :  { %1180 = vmatpush3.bf16.msra.mxu1 %v1177_v24  ;;  %v49_v47 = vld [vmem:[%s1558_s0 + $0x70] sm:$0xff]  ;;  %v50_v48 = vld [vmem:[%s1558_s0 + $0x78] sm:$0xff]  ;;  %v913_v52 = vld [vmem:[%s1562_s4] ss:$0 sm:$0xff]  ;;  %p1248_p4 = pnand %p1247_p3, %p1241_p0 }
  0x1c   :  { %1045 = vmatmul.mubr.msk.f32.gmra.mrb[8].mxu0 %vm72_vm0, %v62_v26  ;;  %v512_v49 = vld [vmem:[%s1563_s5 + $0x30] sm:$0xff]  ;;  %v513_v50 = vld [vmem:[%s1563_s5 + $0x38] sm:$0xff]  ;;  %vm1515_vm8 = vmpackc.low %vm742_vm7, %vm742_vm7 }
  0x1d   :  { %1047 = vmatprep.mubr.msk.f32.mxu0 %vm72_vm0, %v63_v27  ;;  %v1181_v51 = vpack.c.bf16 %v513_v50, %v512_v49 }
  0x1f   :  { %1182 = vmatprep.subr.bf16.mxu1 %v1181_v51 }
  0x20   :  { %1048 = vmatmul.mubr.msk.f32.gmra.mrb[10].mxu0 %vm72_vm0, %v64_v28  ;;  %1184 = vmatpush3.bf16.msra.mxu1 %v1181_v51 }
  0x21   :  { %1050 = vmatprep.mubr.msk.f32.mxu0 %vm72_vm0, %v65_v29 }
  0x24   :  { %1051 = vmatmul.mubr.msk.f32.gmra.mrb[12].mxu0 %vm72_vm0, %v66_v30 }
  0x25   :  { %1053 = vmatprep.mubr.msk.f32.mxu0 %vm72_vm0, %v67_v31 }
  0x28   :  { %1054 = vmatmul.mubr.msk.f32.gmra.mrb[14].mxu0 %vm72_vm0, %v68_v32 }
  0x29   :  { %1060 = vmatprep.mubr.msk.f32.mxu0 %vm270_vm4, %v35_v33 }
  0x2c   :  { %1061 = vmatmul.mubr.msk.f32.vlgmr.msra.gmra.mrb[0].mxu0 %vm270_vm4, %v36_v34 }
  0x2d   :  { %1063 = vmatprep.mubr.msk.f32.mxu0 %vm270_vm4, %v37_v35 }
  0x30   :  { %1064 = vmatmul.mubr.msk.f32.gmra.mrb[2].mxu0 %vm270_vm4, %v38_v36 }
  0x31   :  { %1066 = vmatprep.mubr.msk.f32.mxu0 %vm270_vm4, %v39_v37  ;;  %v1265_v37 = vmov 0.0|0.0  }
  0x32   :  { %1185 = vmatprep.subr.bf16.mxu1 %v1265_v37 }
  0x34   :  { %1067 = vmatmul.mubr.msk.f32.gmra.mrb[4].mxu0 %vm270_vm4, %v40_v38  ;;  %v1267_v38 = vmov 0.0  }
  0x35   :  { %1069 = vmatprep.mubr.msk.f32.mxu0 %vm270_vm4, %v41_v39  ;;  %v732_v39 = vld [vmem:[#allocation2] sm:$0x1] }
  0x38   :  { %1070 = vmatmul.mubr.msk.f32.gmra.mrb[6].mxu0 %vm270_vm4, %v42_v40  ;;  %v1268_v40 = vmov 0  }
  0x39   :  { %1072 = vmatprep.mubr.msk.f32.mxu0 %vm270_vm4, %v43_v41  ;;  %1239 = vset.pattern.permute.xlu0 %v1268_v40  ;;  %v914_v41 = vld [vmem:[%s1564_s6] ss:$0 sm:$0xff] }
  0x3a   :  { %735 = vperm.xlu0 %1239, %v732_v39  }
  0x3c   :  { %1073 = vmatmul.mubr.msk.f32.gmra.mrb[8].mxu0 %vm270_vm4, %v44_v42 }
  0x3d   :  { %1075 = vmatprep.mubr.msk.f32.mxu0 %vm270_vm4, %v45_v43 }
  0x40   :  { %1076 = vmatmul.mubr.msk.f32.gmra.mrb[10].mxu0 %vm270_vm4, %v46_v44 }
  0x41   :  { %1078 = vmatprep.mubr.msk.f32.mxu0 %vm270_vm4, %v47_v45 }
  0x44   :  { %1079 = vmatmul.mubr.msk.f32.gmra.mrb[12].mxu0 %vm270_vm4, %v48_v46 }
  0x45   :  { %1081 = vmatprep.mubr.msk.f32.mxu0 %vm270_vm4, %v49_v47 }
  0x48   :  { %1082 = vmatmul.mubr.msk.f32.gmra.mrb[14].mxu0 %vm270_vm4, %v50_v48 }
  0xb9   :  { %v736_v40 = vpop.permute.xlu0 %735 }
  0xff   :  { %v1062_v53 = vpop.f32.mrb[0].mxu0 }
 0x100   :  { %v475_v54 = vadd.f32 %v1062_v53, %v913_v52  ;;  %v388_v55 = vpop.f32.mrb[1].mxu0 }
 0x101   :  { %v474_v56 = vadd.f32 %v913_v52, %v388_v55 }
 0x102   :  { %v491_v59 = vmax.f32 %v475_v54, 0.0 }
 0x103   :  { %v490_v57 = vmax.f32 %v474_v56, 0.0  ;;  %v1065_v58 = vpop.f32.mrb[2].mxu0 }
 0x104   :  { %v477_v60 = vadd.f32 %v1065_v58, %v913_v52  ;;  %v398_v61 = vpop.f32.mrb[3].mxu0 }
 0x105   :  { %v476_v62 = vadd.f32 %v913_v52, %v398_v61  ;;  %1100 = vmatprep.mubr.msk.f32.mxu1 %vm521_vm5, %v490_v57 }
 0x106   :  { %1101 = vmatmul.mubr.msk.f32.vlgmr.msra.gmra.mrb[0].mxu1 %vm521_vm5, %v491_v59  ;;  %v493_v1 = vmax.f32 %v477_v60, 0.0 }
 0x107   :  { %v492_v63 = vmax.f32 %v476_v62, 0.0  ;;  %v1068_v0 = vpop.f32.mrb[4].mxu0 }
 0x108   :  { %v479_v2 = vadd.f32 %v1068_v0, %v913_v52  ;;  %v408_v3 = vpop.f32.mrb[5].mxu0 }
 0x109   :  { %v478_v4 = vadd.f32 %v913_v52, %v408_v3  ;;  %1103 = vmatprep.mubr.msk.f32.mxu1 %vm521_vm5, %v492_v63 }
 0x10a   :  { %1104 = vmatmul.mubr.msk.f32.gmra.mrb[2].mxu1 %vm521_vm5, %v493_v1  ;;  %v495_v7 = vmax.f32 %v479_v2, 0.0 }
 0x10b   :  { %v494_v5 = vmax.f32 %v478_v4, 0.0  ;;  %v1071_v6 = vpop.f32.mrb[6].mxu0 }
 0x10c   :  { %v481_v8 = vadd.f32 %v1071_v6, %v913_v52  ;;  %v418_v9 = vpop.f32.mrb[7].mxu0 }
 0x10d   :  { %v480_v10 = vadd.f32 %v913_v52, %v418_v9  ;;  %1106 = vmatprep.mubr.msk.f32.mxu1 %vm521_vm5, %v494_v5 }
 0x10e   :  { %1107 = vmatmul.mubr.msk.f32.gmra.mrb[4].mxu1 %vm521_vm5, %v495_v7  ;;  %v497_v13 = vmax.f32 %v481_v8, 0.0 }
 0x10f   :  { %v496_v11 = vmax.f32 %v480_v10, 0.0  ;;  %v1074_v12 = vpop.f32.mrb[8].mxu0 }
 0x110   :  { %v483_v14 = vadd.f32 %v1074_v12, %v913_v52  ;;  %v428_v15 = vpop.f32.mrb[9].mxu0 }
 0x111   :  { %v482_v16 = vadd.f32 %v913_v52, %v428_v15  ;;  %1109 = vmatprep.mubr.msk.f32.mxu1 %vm521_vm5, %v496_v11 }
 0x112   :  { %1110 = vmatmul.mubr.msk.f32.gmra.mrb[6].mxu1 %vm521_vm5, %v497_v13  ;;  %v499_v19 = vmax.f32 %v483_v14, 0.0 }
 0x113   :  { %v498_v17 = vmax.f32 %v482_v16, 0.0  ;;  %v1077_v18 = vpop.f32.mrb[10].mxu0 }
 0x114   :  { %v485_v20 = vadd.f32 %v1077_v18, %v913_v52  ;;  %v438_v21 = vpop.f32.mrb[11].mxu0 }
 0x115   :  { %v484_v22 = vadd.f32 %v913_v52, %v438_v21  ;;  %1112 = vmatprep.mubr.msk.f32.mxu1 %vm521_vm5, %v498_v17 }
 0x116   :  { %1113 = vmatmul.mubr.msk.f32.gmra.mrb[8].mxu1 %vm521_vm5, %v499_v19  ;;  %v501_v25 = vmax.f32 %v485_v20, 0.0 }
 0x117   :  { %v500_v23 = vmax.f32 %v484_v22, 0.0  ;;  %v1080_v24 = vpop.f32.mrb[12].mxu0 }
 0x118   :  { %v487_v26 = vadd.f32 %v1080_v24, %v913_v52  ;;  %v448_v27 = vpop.f32.mrb[13].mxu0 }
 0x119   :  { %v486_v28 = vadd.f32 %v913_v52, %v448_v27  ;;  %1115 = vmatprep.mubr.msk.f32.mxu1 %vm521_vm5, %v500_v23 }
 0x11a   :  { %1116 = vmatmul.mubr.msk.f32.gmra.mrb[10].mxu1 %vm521_vm5, %v501_v25  ;;  %v503_v31 = vmax.f32 %v487_v26, 0.0 }
 0x11b   :  { %v502_v29 = vmax.f32 %v486_v28, 0.0  ;;  %v1083_v30 = vpop.f32.mrb[14].mxu0 }
 0x11c   :  { %v489_v32 = vadd.f32 %v1083_v30, %v913_v52  ;;  %v458_v33 = vpop.f32.mrb[15].mxu0 }
 0x11d   :  { %v488_v34 = vadd.f32 %v913_v52, %v458_v33  ;;  %1118 = vmatprep.mubr.msk.f32.mxu1 %vm521_vm5, %v502_v29 }
 0x11e   :  { %1119 = vmatmul.mubr.msk.f32.gmra.mrb[12].mxu1 %vm521_vm5, %v503_v31  ;;  %v505_v36 = vmax.f32 %v489_v32, 0.0 }
 0x11f   :  { %v504_v35 = vmax.f32 %v488_v34, 0.0 }
 0x121   :  { %1121 = vmatprep.mubr.msk.f32.mxu1 %vm521_vm5, %v504_v35  ;;  %v731_v35 = vld [vmem:[%s1565_s7] sm:$0x1] }
 0x122   :  { %1122 = vmatmul.mubr.msk.f32.gmra.mrb[14].mxu1 %vm521_vm5, %v505_v36  ;;  %v738_v36 = vlaneseq }
 0x123   :  { %1156 = vmatprep.mubr.msk.f32.mxu1 %vm1266_vm6, %v1267_v38 }
 0x124   :  { %v739_v38 = vshrl.u32 %v738_v36, 7 }
 0x126   :  { %v740_v39 = vsub.s32 0, %v739_v38 }
 0x1d9   :  { %v1102_v42 = vpop.f32.mrb[0].mxu1 }
 0x1da   :  { %v642_v43 = vadd.f32 %v1102_v42, %v914_v41  ;;  %v636_v44 = vpop.f32.mrb[1].mxu1 }
 0x1db   :  { %v637_v45 = vadd.f32 %v914_v41, %v636_v44 }
 0x1dc   :  { %v716_v46 = vmax.f32 %v642_v43, 0.0 }
 0x1dd   :  { %v715_v47 = vmax.f32 %v637_v45, 0.0  ;;  %v1105_v48 = vpop.f32.mrb[2].mxu1 }
 0x1de   :  { %v652_v49 = vadd.f32 %v1105_v48, %v914_v41  ;;  %v646_v50 = vpop.f32.mrb[3].mxu1 }
 0x1df   :  { %v1186_v52 = vpack.c.bf16 %v716_v46, %v715_v47  ;;  %v647_v53 = vadd.f32 %v914_v41, %v646_v50 }
 0x1e0   :  { %v718_v54 = vmax.f32 %v652_v49, 0.0 }
 0x1e1   :  { %v717_v55 = vmax.f32 %v647_v53, 0.0  ;;  %v1108_v56 = vpop.f32.mrb[4].mxu1  ;;  %1188 = vmatpush3.bf16.xpose.msk.msra.mxu1 %vm1515_vm8, %v1186_v52 }
 0x1e2   :  { %v662_v57 = vadd.f32 %v1108_v56, %v914_v41  ;;  %v656_v58 = vpop.f32.mrb[5].mxu1  ;;  %1189 = vmatprep.subr.bf16.mxu1 %v1265_v37 }
 0x1e3   :  { %v1190_v59 = vpack.c.bf16 %v718_v54, %v717_v55  ;;  %v657_v60 = vadd.f32 %v914_v41, %v656_v58 }
 0x1e4   :  { %v720_v61 = vmax.f32 %v662_v57, 0.0 }
 0x1e5   :  { %v719_v62 = vmax.f32 %v657_v60, 0.0  ;;  %v1111_v63 = vpop.f32.mrb[6].mxu1 }
 0x1e6   :  { %v672_v0 = vadd.f32 %v1111_v63, %v914_v41  ;;  %v666_v1 = vpop.f32.mrb[7].mxu1 }
 0x1e7   :  { %v1194_v2 = vpack.c.bf16 %v720_v61, %v719_v62  ;;  %v667_v3 = vadd.f32 %v914_v41, %v666_v1 }
 0x1e8   :  { %v722_v4 = vmax.f32 %v672_v0, 0.0 }
 0x1e9   :  { %v721_v5 = vmax.f32 %v667_v3, 0.0  ;;  %v1114_v6 = vpop.f32.mrb[8].mxu1  ;;  %1192 = vmatpush3.bf16.xpose.msk.msra.mxu1 %vm1515_vm8, %v1190_v59 }
 0x1ea   :  { %v682_v7 = vadd.f32 %v1114_v6, %v914_v41  ;;  %v676_v8 = vpop.f32.mrb[9].mxu1  ;;  %1193 = vmatprep.subr.bf16.mxu1 %v1265_v37 }
 0x1eb   :  { %v1198_v9 = vpack.c.bf16 %v722_v4, %v721_v5  ;;  %v677_v10 = vadd.f32 %v914_v41, %v676_v8 }
 0x1ec   :  { %v724_v11 = vmax.f32 %v682_v7, 0.0 }
 0x1ed   :  { %v723_v12 = vmax.f32 %v677_v10, 0.0  ;;  %v1117_v13 = vpop.f32.mrb[10].mxu1 }
 0x1ee   :  { %v692_v14 = vadd.f32 %v1117_v13, %v914_v41  ;;  %v686_v15 = vpop.f32.mrb[11].mxu1 }
 0x1ef   :  { %v1202_v16 = vpack.c.bf16 %v724_v11, %v723_v12  ;;  %v687_v17 = vadd.f32 %v914_v41, %v686_v15 }
 0x1f0   :  { %v726_v18 = vmax.f32 %v692_v14, 0.0 }
 0x1f1   :  { %v725_v19 = vmax.f32 %v687_v17, 0.0  ;;  %v1120_v20 = vpop.f32.mrb[12].mxu1  ;;  %1196 = vmatpush3.bf16.xpose.msk.msra.mxu1 %vm1515_vm8, %v1194_v2 }
 0x1f2   :  { %v702_v21 = vadd.f32 %v1120_v20, %v914_v41  ;;  %v696_v22 = vpop.f32.mrb[13].mxu1  ;;  %1197 = vmatprep.subr.bf16.mxu1 %v1265_v37 }
 0x1f3   :  { %v1206_v23 = vpack.c.bf16 %v726_v18, %v725_v19  ;;  %v697_v24 = vadd.f32 %v914_v41, %v696_v22 }
 0x1f4   :  { %v728_v25 = vmax.f32 %v702_v21, 0.0 }
 0x1f5   :  { %v727_v26 = vmax.f32 %v697_v24, 0.0  ;;  %v1123_v27 = vpop.f32.mrb[14].mxu1 }
 0x1f6   :  { %v712_v28 = vadd.f32 %v1123_v27, %v914_v41  ;;  %v706_v29 = vpop.f32.mrb[15].mxu1 }
 0x1f7   :  { %v1210_v30 = vpack.c.bf16 %v728_v25, %v727_v26  ;;  %v707_v31 = vadd.f32 %v914_v41, %v706_v29  ;;  %v741_v41 = vrot.slane %v736_v40, %v740_v39 }
 0x1f8   :  { %v730_v32 = vmax.f32 %v712_v28, 0.0 }
 0x1f9   :  { %v729_v33 = vmax.f32 %v707_v31, 0.0  ;;  %1200 = vmatpush3.bf16.xpose.msk.msra.mxu1 %vm1515_vm8, %v1198_v9 }
 0x1fa   :  { %1201 = vmatprep.subr.bf16.mxu1 %v1265_v37 }
 0x1fb   :  { %v1214_v34 = vpack.c.bf16 %v730_v32, %v729_v33 }
 0x201   :  { %1204 = vmatpush3.bf16.xpose.msk.msra.mxu1 %vm1515_vm8, %v1202_v16 }
 0x202   :  { %1205 = vmatprep.subr.bf16.mxu1 %v1265_v37 }
 0x209   :  { %1208 = vmatpush3.bf16.xpose.msk.msra.mxu1 %vm1515_vm8, %v1206_v23 }
 0x20a   :  { %1209 = vmatprep.subr.bf16.mxu1 %v1265_v37 }
 0x211   :  { %1212 = vmatpush3.bf16.xpose.msk.msra.mxu1 %vm1515_vm8, %v1210_v30 }
 0x212   :  { %1213 = vmatprep.subr.bf16.mxu1 %v1265_v37 }
 0x219   :  { %1216 = vmatpush3.bf16.xpose.msk.msra.mxu1 %vm1515_vm8, %v1214_v34 }
 0x220   :  { %1157 = vmatmul.mubr.msk.f32.vlgmr.msra.gmra.mrb[16].mxu1 %vm742_vm7, %v731_v35 }
 0x2f3   :  { %v860_v42 = vpop.f32.mrb[16].mxu1 }
 0x2f4   :  { %v861_v43 = vadd.f32 %v860_v42, %v741_v41  ;;  %v1158_v44 = vpop.f32.mrb[17].mxu1 }
 0x2f6   :  { %864 = vst [vmem:[#allocation3] sm:$0x1] %v861_v43 }
 0x2f7   :  { %1251 = shalt.err (!%p1248_p4)
}
 0x2f8   :  { %s1252_s10 = scalar_lea.hbm %s1567_s9, 16 }
 0x2f9   :  { %p1253_p5 = scmp.ne.s32.totalorder %s1567_s9, %s1252_s10  ;;  %p1256_p6 = scmp.lt.u32.totalorder %s1252_s10, %s1567_s9 }
 0x2fb   :  { %p1258_p7 = pnand %p1256_p6, %p1253_p5 }
 0x2fd   :  { %1261 = shalt.err (!%p1258_p7)
}
 0x2fe   :  { %874 = dma.vmem_to_hbm [thread:$0]  %s872_s27, 16, %s1567_s9, [#allocation4]  }
 0x2ff   :  { %1262 = dma.done.wait [#allocation4], 16  }
 0x300   :  { %1263 = vsyncadd [#allocation4], 4294967280 }
 0x301   :  { %878 = vsyncpa [#allocation4], 1 }

</bundles_post_ra>
